<compile_context>
chip_gen: v5e
topology: v5e:2x2
jax: 0.10.0
libtpu: 0.0.40
codegen_flags: <defaults>
</compile_context>

<pallas_src>
import functools

import jax
import jax.numpy as jnp
from jax.experimental import pallas as pl
from jax.experimental.pallas import tpu as pltpu


# ---------------------------------------------------------------------------
# helpers
# ---------------------------------------------------------------------------
def _round_up(x, m):
    return (x + m - 1) // m * m


def _vmem_limit_bytes():
    """Generation-aware scoped-VMEM request: ~3/4 of physical, never the whole thing.

    v7x has only 64 MiB per TensorCore (-> request ~48 MiB); v5e/v6e have 128 MiB
    (-> request 64 MiB, same as a comfortable double-buffered working set needs).
    """
    try:
        cap = pltpu.get_tpu_info().vmem_capacity_bytes
        return int(min(64 << 20, (cap * 3) // 4))
    except Exception:  # pragma: no cover - conservative fallback if query unavailable
        return 48 << 20


def _choose_tiles(n_rows, n_cols, tn=None, tv=None,
                  budget_bytes=4 << 20, row_gran=16, col_gran=128, min_row_tiles=8):
    """Pick (row_tile, vocab_tile).

    Budgeted on the f32 working size (~4 MiB per logit block: near HBM roofline per
    measured tiled-add data, and double-buffered blocks + f32 temporaries stay well
    under the v7x 64 MiB VMEM). Wide vocabs get a chunked class axis. The row tile is
    additionally capped so the 'parallel' row axis has >= min_row_tiles steps
    (megacore load balance on v7x).
    """
    if tv is None:
        tn_full = (budget_bytes // (n_cols * 4)) // row_gran * row_gran
        if tn_full >= 4 * row_gran:
            tv = n_cols                                   # full-vocab blocks
        else:
            # very wide vocab: chunk the class axis (online LSE / running row-sum)
            tv = max(col_gran,
                     (budget_bytes // (8 * row_gran * 4)) // col_gran * col_gran)
            tv = min(tv, _round_up(n_cols, col_gran))
    if tn is None:
        tn = max(row_gran, (budget_bytes // (tv * 4)) // row_gran * row_gran)
        tn = min(tn, _round_up(n_rows, row_gran))         # don't exceed (padded) batch
        tn = min(tn, max(row_gran,
                         _round_up(pl.cdiv(n_rows, min_row_tiles), row_gran)))
    return tn, tv


# ---------------------------------------------------------------------------
# Kernel 1: softmax cross entropy with ignore_index
#   grid = (row tiles [parallel], vocab chunks [arbitrary, innermost])
#   online log-sum-exp + one-hot pick accumulated in VMEM scratch,
#   per-row loss written once at the last vocab chunk.
# ---------------------------------------------------------------------------
def _ce_kernel(nv_ref, tgt_ref, logit_ref, loss_ref, m_sc, s_sc, p_sc,
               *, pad_token_id, vocab, tn, tv):
    i = pl.program_id(0)
    k = pl.program_id(1)

    @pl.when(k == 0)
    def _():
        m_sc[...] = jnp.full_like(m_sc, -jnp.inf)
        s_sc[...] = jnp.zeros_like(s_sc)
        p_sc[...] = jnp.zeros_like(p_sc)

    x = logit_ref[...].astype(jnp.float32)                    # (tn, tv)
    tgt = tgt_ref[...]                                         # (tn, 1) int32

    col = jax.lax.broadcasted_iota(jnp.int32, x.shape, 1) + k * tv
    if vocab % tv != 0:
        # ragged last vocab chunk: neutralize out-of-bounds lanes (-inf -> exp == 0)
        x = jnp.where(col < vocab, x, -jnp.inf)

    # online (streaming) log-sum-exp
    m_prev = m_sc[...]
    m_new = jnp.maximum(m_prev, jnp.max(x, axis=-1, keepdims=True))
    s_sc[...] = (s_sc[...] * jnp.exp(m_prev - m_new)
                 + jnp.sum(jnp.exp(x - m_new), axis=-1, keepdims=True))
    m_sc[...] = m_new

    # gather logit at the target index via one-hot compare
    # (contributes from exactly one vocab chunk; no dynamic gather on TPU)
    p_sc[...] += jnp.sum(jnp.where(col == tgt, x, 0.0), axis=-1, keepdims=True)

    @pl.when(k == pl.num_programs(1) - 1)
    def _():
        # jnp.where (not multiply) so garbage tail rows can never leak Inf/NaN.
        row = jax.lax.broadcasted_iota(jnp.int32, (tn, 1), 0) + i * tn
        valid = jnp.logical_and(row < nv_ref[0], tgt != pad_token_id)
        lse = m_sc[...] + jnp.log(s_sc[...])
        loss_ref[...] = jnp.where(valid, lse - p_sc[...], 0.0)


def _ce_loss_pallas(target, logit, pad_token_id, tn=None, tv=None):
    N, I = logit.shape
    tn, tv = _choose_tiles(N, I, tn=tn, tv=tv)
    n_row_tiles = pl.cdiv(N, tn)
    n_col_tiles = pl.cdiv(I, tv)
    n_rows_pad = n_row_tiles * tn

    # Only the *tiny* target array is padded (pad rows carry the ignore index);
    # the big logit matrix is streamed in place and the ragged tail is masked in-kernel.
    tgt = target.astype(jnp.int32)
    if n_rows_pad != N:
        tgt = jnp.pad(tgt, (0, n_rows_pad - N), constant_values=pad_token_id)
    tgt2 = tgt.reshape(n_rows_pad, 1)
    n_valid = jnp.array([N], jnp.int32)                       # SMEM scalar prefetch

    kernel = functools.partial(_ce_kernel, pad_token_id=pad_token_id,
                               vocab=I, tn=tn, tv=tv)
    row_loss = pl.pallas_call(
        kernel,
        out_shape=jax.ShapeDtypeStruct((n_rows_pad, 1), jnp.float32),
        grid_spec=pltpu.PrefetchScalarGridSpec(
            num_scalar_prefetch=1,
            grid=(n_row_tiles, n_col_tiles),
            in_specs=[
                pl.BlockSpec((tn, 1), lambda i, k, nv: (i, 0)),
                pl.BlockSpec((tn, tv), lambda i, k, nv: (i, k)),
            ],
            out_specs=pl.BlockSpec((tn, 1), lambda i, k, nv: (i, 0)),
            scratch_shapes=[pltpu.VMEM((tn, 1), jnp.float32)] * 3,
        ),
        compiler_params=pltpu.CompilerParams(
            dimension_semantics=("parallel", "arbitrary"),
            vmem_limit_bytes=_vmem_limit_bytes(),
        ),
    )(n_valid, tgt2, logit)

    # Tiny final reduction outside the kernel (tree-reduced, good f32 accumulation).
    # NOTE: if every target == pad_token_id this is 0/0 = NaN, matching PyTorch.
    denom = jnp.sum((target != pad_token_id).astype(jnp.float32))
    return jnp.sum(row_loss) / denom


# ---------------------------------------------------------------------------
# Kernel 2: BCE-with-logits against an in-kernel multi-hot built from sparse ids
#   grid = (row tiles [parallel], vocab chunks [arbitrary, innermost])
#   running per-row sum in VMEM scratch, written once at the last vocab chunk.
# ---------------------------------------------------------------------------
def _bce_kernel(nv_ref, tgt_ref, logit_ref, out_ref, acc_sc,
                *, pad_token_id, vocab, tn, tv):
    i = pl.program_id(0)
    k = pl.program_id(1)

    @pl.when(k == 0)
    def _():
        acc_sc[...] = jnp.zeros_like(acc_sc)

    x = logit_ref[...].astype(jnp.float32)                    # (tn, tv)
    ids = tgt_ref[...]                                         # (tn, BS) int32

    # rebuild the multi-hot mask in-register: hit where global column matches any
    # basket id, with the pad column zeroed (matches convert_target_to_multi_hot)
    col = jax.lax.broadcasted_iota(jnp.int32, x.shape, 1) + k * tv
    bs = ids.shape[1]
    hit = col == ids[:, 0:1]
    for b in range(1, bs):
        hit = jnp.logical_or(hit, col == ids[:, b:b + 1])
    hit = jnp.logical_and(hit, col != pad_token_id)

    # numerically stable BCEWithLogits: max(x,0) - x*y + log(1 + exp(-|x|)), y in {0,1}
    per = jnp.maximum(x, 0.0) - jnp.where(hit, x, 0.0) + jnp.log1p(jnp.exp(-jnp.abs(x)))
    if vocab % tv != 0:
        per = jnp.where(col < vocab, per, 0.0)                # ragged last vocab chunk

    acc_sc[...] += jnp.sum(per, axis=-1, keepdims=True)

    @pl.when(k == pl.num_programs(1) - 1)
    def _():
        # zero rows that only exist because of row-tile alignment (garbage-safe where)
        row = jax.lax.broadcasted_iota(jnp.int32, (tn, 1), 0) + i * tn
        out_ref[...] = jnp.where(row < nv_ref[0], acc_sc[...], 0.0)


def _bce_loss_pallas(target_ids, logit, pad_token_id, tn=None, tv=None):
    N, I = logit.shape
    BS = target_ids.shape[1]
    tn, tv = _choose_tiles(N, I, tn=tn, tv=tv)
    n_row_tiles = pl.cdiv(N, tn)
    n_col_tiles = pl.cdiv(I, tv)
    n_rows_pad = n_row_tiles * tn

    ids = target_ids.astype(jnp.int32)
    if n_rows_pad != N:
        ids = jnp.pad(ids, ((0, n_rows_pad - N), (0, 0)), constant_values=pad_token_id)
    n_valid = jnp.array([N], jnp.int32)

    kernel = functools.partial(_bce_kernel, pad_token_id=pad_token_id,
                               vocab=I, tn=tn, tv=tv)
    row_sum = pl.pallas_call(
        kernel,
        out_shape=jax.ShapeDtypeStruct((n_rows_pad, 1), jnp.float32),
        grid_spec=pltpu.PrefetchScalarGridSpec(
            num_scalar_prefetch=1,
            grid=(n_row_tiles, n_col_tiles),
            in_specs=[
                pl.BlockSpec((tn, BS), lambda i, k, nv: (i, 0)),
                pl.BlockSpec((tn, tv), lambda i, k, nv: (i, k)),
            ],
            out_specs=pl.BlockSpec((tn, 1), lambda i, k, nv: (i, 0)),
            scratch_shapes=[pltpu.VMEM((tn, 1), jnp.float32)],
        ),
        compiler_params=pltpu.CompilerParams(
            dimension_semantics=("parallel", "arbitrary"),
            vmem_limit_bytes=_vmem_limit_bytes(),
        ),
    )(n_valid, ids, logit)
    return jnp.sum(row_sum) / (N * I)


# ---------------------------------------------------------------------------
# Dispatch (mimics CrossEntropyLoss.forward; item_tokenizer -> vocab_size/pad id)
# ---------------------------------------------------------------------------
def cross_entropy_loss(target, logit, *, vocab_size, pad_token_id, tn=None, tv=None):
    if target.ndim == 1:
        return _ce_loss_pallas(target, logit, pad_token_id, tn=tn, tv=tv)
    assert vocab_size == logit.shape[1], "len(item_tokenizer) must equal logit dim I"
    return _bce_loss_pallas(target, logit, pad_token_id, tn=tn, tv=tv)


# ---------------------------------------------------------------------------
# Pure-JAX references for verification
# ---------------------------------------------------------------------------
def _ce_ref(target, logit, pad_token_id):
    x = logit.astype(jnp.float32)
    lse = jax.scipy.special.logsumexp(x, axis=-1)
    picked = jnp.take_along_axis(x, target[:, None].astype(jnp.int32), axis=-1)[:, 0]
    valid = (target != pad_token_id).astype(jnp.float32)
    return jnp.sum((lse - picked) * valid) / jnp.sum(valid)


def _multi_hot_ref(target, vocab_size, pad_token_id):
    N = target.shape[0]
    mh = jnp.zeros((N, vocab_size), jnp.float32)
    mh = mh.at[jnp.arange(N)[:, None], target].set(1.0)
    mh = mh.at[:, pad_token_id].set(0.0)
    return mh


def _bce_ref(logit, y):
    x = logit.astype(jnp.float32)
    per = jnp.maximum(x, 0.0) - x * y + jnp.log1p(jnp.exp(-jnp.abs(x)))
    return jnp.mean(per)


if __name__ == "__main__":
    # "tokenizer" config
    VOCAB = 384          # len(item_tokenizer)
    PAD = 0              # item_tokenizer.pad_token_id

    N, BS = 50, 4        # N not a multiple of the tile -> exercises the ragged tail path
    key = jax.random.PRNGKey(0)
    k1, k2, k3 = jax.random.split(key, 3)

    logit = jax.random.normal(k1, (N, VOCAB), jnp.float32)

    # --- CE branch: 1-D target with some pad entries (ignored) ---
    target_1d = jax.random.randint(k2, (N,), 0, VOCAB, dtype=jnp.int32)
    target_1d = target_1d.at[::5].set(PAD)  # make some rows padded
    ref_ce = _ce_ref(target_1d, logit, PAD)

    loss_ce = jax.block_until_ready(
        cross_entropy_loss(target_1d, logit, vocab_size=VOCAB, pad_token_id=PAD))
    assert jnp.allclose(loss_ce, ref_ce, rtol=1e-4, atol=1e-4), (loss_ce, ref_ce)

    # explicit small tiles: multi-row-tile grid + vocab chunking with a ragged
    # last chunk (384 % 256 != 0) to exercise the online-LSE / column-mask path
    loss_ce_mt = jax.block_until_ready(
        cross_entropy_loss(target_1d, logit, vocab_size=VOCAB, pad_token_id=PAD,
                           tn=16, tv=256))
    assert jnp.allclose(loss_ce_mt, ref_ce, rtol=1e-4, atol=1e-4), (loss_ce_mt, ref_ce)

    # --- BCE branch: 2-D (basket) target -> in-kernel multi-hot + BCEWithLogits ---
    target_2d = jax.random.randint(k3, (N, BS), 0, VOCAB, dtype=jnp.int32)
    ref_bce = _bce_ref(logit, _multi_hot_ref(target_2d, VOCAB, PAD))

    loss_bce = jax.block_until_ready(
        cross_entropy_loss(target_2d, logit, vocab_size=VOCAB, pad_token_id=PAD))
    assert jnp.allclose(loss_bce, ref_bce, rtol=1e-4, atol=1e-4), (loss_bce, ref_bce)

    loss_bce_mt = jax.block_until_ready(
        cross_entropy_loss(target_2d, logit, vocab_size=VOCAB, pad_token_id=PAD,
                           tn=16, tv=256))
    assert jnp.allclose(loss_bce_mt, ref_bce, rtol=1e-4, atol=1e-4), (loss_bce_mt, ref_bce)

    print("KERNEL_OK")
</pallas_src>

<mosaic_0001>
module attributes {stable_mosaic.version = 11 : i64} {
  func.func @_ce_kernel(%arg0: i32, %arg1: i32, %arg2: memref<1xi32, #tpu.memory_space<smem>>, %arg3: memref<16x1xi32, #tpu.memory_space<vmem>>, %arg4: memref<16x384xf32, #tpu.memory_space<vmem>>, %arg5: memref<16x1xf32, #tpu.memory_space<vmem>>, %arg6: memref<16x1xf32, #tpu.memory_space<vmem>>, %arg7: memref<16x1xf32, #tpu.memory_space<vmem>>, %arg8: memref<16x1xf32, #tpu.memory_space<vmem>>) attributes {dimension_semantics = [#tpu.dimension_semantics<parallel>, #tpu.dimension_semantics<arbitrary>], iteration_bounds = array<i64: 4, 1>, scalar_prefetch = 1 : i64, scratch_operands = 3 : i64, tpu.core_type = #tpu.core_type<tc>, window_params = [{transform_indices = @transform_0, window_bounds = array<i64: 16, 1>}, {transform_indices = @transform_1, window_bounds = array<i64: 16, 384>}, {transform_indices = @transform_2, window_bounds = array<i64: 16, 1>}]} {
    %c0_i32 = arith.constant 0 : i32
    %0 = arith.cmpi eq, %arg1, %c0_i32 : i32
    %1 = arith.extui %0 : i1 to i32
    %c0_i32_0 = arith.constant 0 : i32
    %2 = arith.cmpi ne, %1, %c0_i32_0 : i32
    scf.if %2 {
      %cst_21 = arith.constant 0xFF800000 : f32
      %37 = vector.broadcast %cst_21 : f32 to vector<16x1xf32>
      %c0_22 = arith.constant 0 : index
      %c0_23 = arith.constant 0 : index
      %38 = vector.load %arg6[%c0_22, %c0_23] : memref<16x1xf32, #tpu.memory_space<vmem>>, vector<16x1xf32>
      tpu.vector_store %arg6[%c0_22, %c0_23], %37 {strides = array<i32>} : memref<16x1xf32, #tpu.memory_space<vmem>>, vector<16x1xf32>,
      %cst_24 = arith.constant 0.000000e+00 : f32
      %39 = vector.broadcast %cst_24 : f32 to vector<16x1xf32>
      %c0_25 = arith.constant 0 : index
      %c0_26 = arith.constant 0 : index
      %40 = vector.load %arg7[%c0_25, %c0_26] : memref<16x1xf32, #tpu.memory_space<vmem>>, vector<16x1xf32>
      tpu.vector_store %arg7[%c0_25, %c0_26], %39 {strides = array<i32>} : memref<16x1xf32, #tpu.memory_space<vmem>>, vector<16x1xf32>,
      %cst_27 = arith.constant 0.000000e+00 : f32
      %41 = vector.broadcast %cst_27 : f32 to vector<16x1xf32>
      %c0_28 = arith.constant 0 : index
      %c0_29 = arith.constant 0 : index
      %42 = vector.load %arg8[%c0_28, %c0_29] : memref<16x1xf32, #tpu.memory_space<vmem>>, vector<16x1xf32>
      tpu.vector_store %arg8[%c0_28, %c0_29], %41 {strides = array<i32>} : memref<16x1xf32, #tpu.memory_space<vmem>>, vector<16x1xf32>,
    } else {
    }
    %c0 = arith.constant 0 : index
    %c0_1 = arith.constant 0 : index
    %3 = vector.load %arg4[%c0, %c0_1] : memref<16x384xf32, #tpu.memory_space<vmem>>, vector<16x384xf32>
    %c0_2 = arith.constant 0 : index
    %c0_3 = arith.constant 0 : index
    %4 = vector.load %arg3[%c0_2, %c0_3] : memref<16x1xi32, #tpu.memory_space<vmem>>, vector<16x1xi32>
    %5 = tpu.iota {dimensions = array<i32: 1>} : vector<16x384xi32>
    %c384_i32 = arith.constant 384 : i32
    %6 = arith.muli %arg1, %c384_i32 : i32
    %7 = vector.broadcast %6 : i32 to vector<16x384xi32>
    %8 = arith.addi %5, %7 : vector<16x384xi32>
    %c0_4 = arith.constant 0 : index
    %c0_5 = arith.constant 0 : index
    %9 = vector.load %arg6[%c0_4, %c0_5] : memref<16x1xf32, #tpu.memory_space<vmem>>, vector<16x1xf32>
    %cst = arith.constant dense<0xFF800000> : vector<16xf32>
    %10 = vector.multi_reduction <maximumf>, %3, %cst [1] : vector<16x384xf32> to vector<16xf32>
    %11 = vector.shape_cast %10 : vector<16xf32> to vector<16x1xf32>
    %12 = arith.maximumf %9, %11 : vector<16x1xf32>
    %c0_6 = arith.constant 0 : index
    %c0_7 = arith.constant 0 : index
    %13 = vector.load %arg7[%c0_6, %c0_7] : memref<16x1xf32, #tpu.memory_space<vmem>>, vector<16x1xf32>
    %14 = arith.subf %9, %12 : vector<16x1xf32>
    %15 = math.exp %14 : vector<16x1xf32>
    %16 = arith.mulf %13, %15 : vector<16x1xf32>
    %17 = vector.broadcast %12 : vector<16x1xf32> to vector<16x384xf32>
    %18 = arith.subf %3, %17 : vector<16x384xf32>
    %19 = math.exp %18 : vector<16x384xf32>
    %cst_8 = arith.constant dense<0.000000e+00> : vector<16xf32>
    %20 = vector.multi_reduction <add>, %19, %cst_8 [1] : vector<16x384xf32> to vector<16xf32>
    %21 = vector.shape_cast %20 : vector<16xf32> to vector<16x1xf32>
    %22 = arith.addf %16, %21 : vector<16x1xf32>
    %c0_9 = arith.constant 0 : index
    %c0_10 = arith.constant 0 : index
    %23 = vector.load %arg7[%c0_9, %c0_10] : memref<16x1xf32, #tpu.memory_space<vmem>>, vector<16x1xf32>
    tpu.vector_store %arg7[%c0_9, %c0_10], %22 {strides = array<i32>} : memref<16x1xf32, #tpu.memory_space<vmem>>, vector<16x1xf32>,
    %c0_11 = arith.constant 0 : index
    %c0_12 = arith.constant 0 : index
    %24 = vector.load %arg6[%c0_11, %c0_12] : memref<16x1xf32, #tpu.memory_space<vmem>>, vector<16x1xf32>
    tpu.vector_store %arg6[%c0_11, %c0_12], %12 {strides = array<i32>} : memref<16x1xf32, #tpu.memory_space<vmem>>, vector<16x1xf32>,
    %c0_13 = arith.constant 0 : index
    %c0_14 = arith.constant 0 : index
    %25 = vector.load %arg8[%c0_13, %c0_14] : memref<16x1xf32, #tpu.memory_space<vmem>>, vector<16x1xf32>
    %26 = vector.broadcast %4 : vector<16x1xi32> to vector<16x384xi32>
    %27 = arith.cmpi eq, %8, %26 : vector<16x384xi32>
    %cst_15 = arith.constant 0.000000e+00 : f32
    %28 = vector.broadcast %cst_15 : f32 to vector<16x384xf32>
    %29 = arith.select %27, %3, %28 : vector<16x384xi1>, vector<16x384xf32>
    %cst_16 = arith.constant dense<0.000000e+00> : vector<16xf32>
    %30 = vector.multi_reduction <add>, %29, %cst_16 [1] : vector<16x384xf32> to vector<16xf32>
    %31 = vector.shape_cast %30 : vector<16xf32> to vector<16x1xf32>
    %32 = arith.addf %25, %31 : vector<16x1xf32>
    %c0_17 = arith.constant 0 : index
    %c0_18 = arith.constant 0 : index
    %33 = vector.load %arg8[%c0_17, %c0_18] : memref<16x1xf32, #tpu.memory_space<vmem>>, vector<16x1xf32>
    tpu.vector_store %arg8[%c0_17, %c0_18], %32 {strides = array<i32>} : memref<16x1xf32, #tpu.memory_space<vmem>>, vector<16x1xf32>,
    %c0_i32_19 = arith.constant 0 : i32
    %34 = arith.cmpi eq, %arg1, %c0_i32_19 : i32
    %35 = arith.extui %34 : i1 to i32
    %c0_i32_20 = arith.constant 0 : i32
    %36 = arith.cmpi ne, %35, %c0_i32_20 : i32
    scf.if %36 {
      %37 = tpu.iota {dimensions = array<i32: 0>} : vector<16x1xi32>
      %c16_i32 = arith.constant 16 : i32
      %38 = arith.muli %arg0, %c16_i32 : i32
      %39 = vector.broadcast %38 : i32 to vector<16x1xi32>
      %40 = arith.addi %37, %39 : vector<16x1xi32>
      %c0_21 = arith.constant 0 : index
      %41 = memref.load %arg2[%c0_21] : memref<1xi32, #tpu.memory_space<smem>>
      %42 = vector.broadcast %41 : i32 to vector<16x1xi32>
      %43 = arith.cmpi slt, %40, %42 : vector<16x1xi32>
      %c0_i32_22 = arith.constant 0 : i32
      %44 = vector.broadcast %c0_i32_22 : i32 to vector<16x1xi32>
      %45 = arith.cmpi ne, %4, %44 : vector<16x1xi32>
      %46 = arith.andi %43, %45 : vector<16x1xi1>
      %c0_23 = arith.constant 0 : index
      %c0_24 = arith.constant 0 : index
      %47 = vector.load %arg6[%c0_23, %c0_24] : memref<16x1xf32, #tpu.memory_space<vmem>>, vector<16x1xf32>
      %c0_25 = arith.constant 0 : index
      %c0_26 = arith.constant 0 : index
      %48 = vector.load %arg7[%c0_25, %c0_26] : memref<16x1xf32, #tpu.memory_space<vmem>>, vector<16x1xf32>
      %49 = math.log %48 : vector<16x1xf32>
      %50 = arith.addf %47, %49 : vector<16x1xf32>
      %c0_27 = arith.constant 0 : index
      %c0_28 = arith.constant 0 : index
      %51 = vector.load %arg8[%c0_27, %c0_28] : memref<16x1xf32, #tpu.memory_space<vmem>>, vector<16x1xf32>
      %52 = arith.subf %50, %51 : vector<16x1xf32>
      %cst_29 = arith.constant 0.000000e+00 : f32
      %53 = vector.broadcast %cst_29 : f32 to vector<16x1xf32>
      %54 = arith.select %46, %52, %53 : vector<16x1xi1>, vector<16x1xf32>
      %c0_30 = arith.constant 0 : index
      %c0_31 = arith.constant 0 : index
      %55 = vector.load %arg5[%c0_30, %c0_31] : memref<16x1xf32, #tpu.memory_space<vmem>>, vector<16x1xf32>
      tpu.vector_store %arg5[%c0_30, %c0_31], %54 {strides = array<i32>} : memref<16x1xf32, #tpu.memory_space<vmem>>, vector<16x1xf32>,
    } else {
    }
    return
  }
  func.func @transform_0(%arg0: i32, %arg1: i32, %arg2: memref<1xi32, #tpu.memory_space<smem>>) -> (i32, i32) {
    %c0_i32 = arith.constant 0 : i32
    %c0_i32_0 = arith.constant 0 : i32
    return %arg0, %c0_i32 : i32, i32
  }
  func.func @transform_1(%arg0: i32, %arg1: i32, %arg2: memref<1xi32, #tpu.memory_space<smem>>) -> (i32, i32) {
    %c0_i32 = arith.constant 0 : i32
    return %arg0, %arg1 : i32, i32
  }
  func.func @transform_2(%arg0: i32, %arg1: i32, %arg2: memref<1xi32, #tpu.memory_space<smem>>) -> (i32, i32) {
    %c0_i32 = arith.constant 0 : i32
    %c0_i32_0 = arith.constant 0 : i32
    return %arg0, %c0_i32 : i32, i32
  }
}

</mosaic_0001>

<bundles_post_ra>
// kernel: tpu_custom_call.1
= control target key start
LH: loop header
LB: loop body
LE: loop exit
PB: predicated region body
PF: predicated region fallthrough
CT: control target
= control target key end

     0   :  { %s886_s0 = inlined_call_operand.<no memory space> [shape: s32[1], index: 0, kind: input, shape index: {}]   ;;  %s887_s1 = inlined_call_operand.vmem [shape: s32[64,1], index: 1, kind: input, shape index: {}]   ;;  %s888_s2 = inlined_call_operand.hbm [shape: f32[50,384], index: 2, kind: input, shape index: {}]   ;;  %s889_s3 = inlined_call_operand.vmem [shape: f32[64,1], index: 3, kind: output, shape index: {}]  }
   0x1   :  { %8 = sst [smem:[#allocation6]] %s886_s0 }
   0x2   :  { %9 = vsyncpa [#allocation8], 0 }
   0x3   :  { %11 = vsyncpa [#allocation8 + $0x1], 0  ;;  %s694_s14 = smov 0   ;;  %s696_s15 = smov 0  }
   0x4   :  { %s698_s16 = smov 0   ;;  %s700_s17 = smov 0  }
   0x5   :  { %s702_s18 = smov 0   ;;  %s704_s19 = smov 0  }
   0x6 LB: > { %s475_s0 = sadd.s32 4294967295, %s663_s19   ;;  %s29_s20 = sadd.s32 1, %s659_s18  ;;  %s663_s19 = sphi %s704_s19, %s17_s19   ;;  %s659_s18 = sphi %s702_s18, %s896_s18   ;;  %s655_s17 = sphi %s700_s17, %s895_s17   ;;  %s651_s16 = sphi %s698_s16, %s894_s16   ;;  %s647_s15 = sphi %s696_s15, %s893_s15   ;;  %s643_s14 = sphi %s694_s14, %s892_s14  }
   0x7   : > { %p31_p0 = scmp.ge.s32.totalorder %s29_s20, 4  ;;  %s64_s21 = sadd.s32 1, %s651_s16 }
   0x8   : > { %p71_p1 = scmp.ne.s32.totalorder %s651_s16, %s647_s15  ;;  %p72_p2 = scmp.eq.s32.totalorder %s663_s19, 0 }
   0x9   : > { %s898_s20 = smov (%p31_p0, %s29_s20), 0  ;;  %p77_p4 = scmp.ne.s32.totalorder %s647_s15, %s643_s14 }
   0xa   : > { %p73_p3 = por %p72_p2, %p71_p1  ;;  %s59_s22 = ssub.s32 %s659_s18, %s898_s20 }
   0xb   : > { %p78_p5 = scmp.eq.s32.totalorder %s475_s0, 0  ;;  %p62_p6 = scmp.eq.s32.totalorder %s59_s22, 0 }
   0xc   : > { %p478_p8 = scmp.ge.s32.totalorder %s663_s19, 4 }
   0xd   : > { %p733_p7 = por %p78_p5, %p77_p4 }
   0xe   : > { %s738_s24 = scalar_select %p62_p6, %s651_s16, %s64_s21  }
   0xf   : > { %123 = sbr.rel (%p478_p8) target bundleno = 61 (0x3d), region = 16 }
  0x14   : > { %135 = sbr.rel (!%p73_p3) target bundleno = 61 (0x3d), region = 24  ;;  %s136_s25 = sand.u32 (%p73_p3), 1, %s651_s16  }
  0x15   : > { %s479_s26 = sshll.u32 (%p73_p3), %s659_s18, 1  ;;  %s494_s27 = smul.u32 (%p73_p3), 48, %s136_s25 }
  0x16   : > { %s143_s28 = ssub.s32 (%p73_p3), 7, %s479_s26  ;;  %s743_s5 = scalar_lea.sflag (%p73_p3), [#allocation8], %s136_s25 }
  0x17   : > { %p144_p9 = scmp.lt.s32.totalorder (%p73_p3), %s143_s28, 2  ;;  %s140_s6 = scalar_lea.vmem (%p73_p3), [#allocation7], %s494_s27 }
  0x19   : > { %s900_s28 = smov (!%p144_p9, %s143_s28), 2 }
  0x1a   : > { %s481_s29 = smul.u32 24, %s900_s28 }
  0x1c   : > { %s148_s30 = ssub.s32 48, %s481_s29 }
  0x1d   : > { %s149_s4 = sshll.u32 %s148_s30, 4 }
  0x1e   : > { %150 = vsyncadd %s743_s5, %s149_s4  ;;  %p746_p10 = scmp.ne.s32.totalorder %s481_s29, 0  ;;  %s495_s8 = smul.u32 48, %s659_s18 }
  0x1f   : > { %s751_s9 = sshll.u32 %s140_s6, 4  ;;  %s753_s10 = smul.u32 384, %s900_s28  ;;  %s160_s9 = int_to_ptr.vmem [resolvable:$true] %s751_s9 }
  0x20   : > { %s155_s13 = scalar_lea.hbm %s888_s2, %s495_s8  ;;  %s585_s29 = scalar_lea.hbm %s888_s2, 168 }
  0x21   : > { %s157_s14 = sshll.u32 %s155_s13, 4  ;;  %s576_s21 = sshrl.u32 %s753_s10, 4  ;;  %s759_s14 = int_to_ptr.hbm [resolvable:$true] %s157_s14 }
  0x22   : > { %s574_s0 = sshra.s32 %s759_s14, 4  ;;  %s612_s22 = sshll.u32 %s576_s21, 4  ;;  %s575_s0 = int_to_ptr.hbm [resolvable:$true] %s574_s0 }
  0x23   : > { %p578_p11 = scmp.ne.s32.totalorder %s612_s22, %s753_s10  ;;  %s579_s25 = sadd.s32 1, %s576_s21 }
  0x25   : > { %s902_s25 = smov (!%p578_p11, %s579_s25), %s576_s21 }
  0x26   : > { %s581_s26 = scalar_lea.hbm %s575_s0, %s902_s25 }
  0x27   : > { %p582_p12 = scmp.ne.s32.totalorder %s575_s0, %s581_s26  ;;  %p587_p1 = scmp.lt.s32.totalorder %s585_s29, %s581_s26 }
  0x29   : > { %p583_p13 = pnand %p582_p12, %p746_p10 }
  0x2b   : > { %p584_p0 = pneg %p583_p13 }
  0x2d   : > { %p589_p2 = pnand %p587_p1, %p584_p0 }
  0x2f   : > { %592 = shalt.err (!%p589_p2)
}
  0x30   : > { %s593_s30 = sshra.s32 %s160_s9, 4  ;;  %s665_s6 = smov [#allocation7]   ;;  %s594_s30 = int_to_ptr.vmem [resolvable:$true] %s593_s30 }
  0x31   : > { %s600_s4 = scalar_lea.vmem %s594_s30, %s902_s25  ;;  %s604_s8 = scalar_lea.vmem %s665_s6, 96 }
  0x32   : > { %p601_p3 = scmp.ne.s32.totalorder %s594_s30, %s600_s4  ;;  %p606_p6 = scmp.lt.s32.totalorder %s604_s8, %s600_s4 }
  0x34   : > { %p602_p4 = pnand %p601_p3, %p746_p10 }
  0x36   : > { %p603_p5 = pneg %p602_p4 }
  0x38   : > { %p608_p8 = pnand %p606_p6, %p603_p5 }
  0x3a   : > { %611 = shalt.err (!%p608_p8)
}
  0x3b   : > { %s666_s11 = smov 384   ;;  %s667_s12 = smov 24  }
  0x3c   : > { %165 = dma.hbm_to_vmem [thread:$0]  (%p746_p10), %s759_s14, %s753_s10, %s160_s9, %s743_s5, %s666_s11, %s666_s11, %s667_s12  }
  0x3d PF: > { %p486_p9 = scmp.ge.s32.totalorder %s663_s19, 1  ;;  %p167_p11 = scmp.lt.s32.totalorder %s663_s19, 5 }
  0x3f   : > { %p168_p12 = pnand %p486_p9, %p167_p11 }
  0x40   : > { %s173_s13 = sand.u32 (!%p168_p12), 1, %s647_s15  }
  0x41   : > { %171 = sbr.rel (%p168_p12) target bundleno = 475 (0x1db), region = 28  ;;  %s174_s21 = scalar_lea.sflag (!%p168_p12), [#allocation8], %s173_s13 }
  0x42   : > { %s496_s0 = smul.u32 (!%p168_p12), 48, %s173_s13 }
  0x44   : > { %s177_s22 = scalar_lea.vmem (!%p168_p12), [#allocation7], %s496_s0 }
  0x46   : > { %638 = dma.done.wait (%p733_p7), %s174_s21, 768  }
  0x47   : > { %640 = vsyncadd (%p733_p7), %s174_s21, 4294966528  ;;  %vm227_vm0 = vcmask 7168   ;;  %v668_v0 = vmov -inf   ;;  %v234_v1 = vld [vmem:[%s177_s22] sm:$0xff]  ;;  %v235_v2 = vld [vmem:[%s177_s22 + $0x8] sm:$0xff]  ;;  %s487_s23 = sshll.u32 %s655_s17, 1  ;;  %v242_v23 = vlaneseq }
  0x48   : > { %228 = vst.msk [vmem:[#allocation2] sm:$0xff] %vm227_vm0, %v668_v0  ;;  %v236_v3 = vld [vmem:[%s177_s22 + $0x10] sm:$0xff]  ;;  %v789_v5 = vld [vmem:[%s177_s22 + $0x18] sm:$0xff]  ;;  %v791_v6 = vld [vmem:[%s177_s22 + $0x28] sm:$0xff]  ;;  %v669_v11 = vmov 0   ;;  %p205_p7 = scmp.lt.s32.totalorder %s487_s23, 7 }
  0x49   : > { %229 = vst.msk [vmem:[#allocation2 + $0x8] sm:$0xff] %vm227_vm0, %v668_v0  ;;  %v253_v4 = vmax.f32 %v234_v1, %v236_v3  ;;  %v257_v8 = vmax.f32 %v789_v5, %v791_v6  ;;  %v795_v9 = vld [vmem:[%s177_s22 + $0x20] sm:$0xff]  ;;  %551 = vset.pattern.permute.xlu1 %v669_v11  ;;  %552 = vset.pattern.permute.xlu2 %v669_v11  ;;  %v670_v12 = vmov 0.0   ;;  %v243_v24 = vand.u32 127, %v242_v23  ;;  %s852_s14 = sld [smem:[#allocation6]]  ;;  %s491_s25 = sshll.u32 %s655_s17, 4 }
  0x4a   : > { %553 = vset.pattern.permute.xlu0 %v669_v11  ;;  %s904_s23 = smov (!%p205_p7, %s487_s23), 7  ;;  %230 = vst.msk [vmem:[#allocation3] sm:$0xff] %vm227_vm0, %v670_v12 }
  0x4b   : > { %v254_v7 = vmax.f32 %v253_v4, %v235_v2  ;;  %v258_v10 = vmax.f32 %v257_v8, %v795_v9  ;;  %231 = vst.msk [vmem:[#allocation3 + $0x8] sm:$0xff] %vm227_vm0, %v670_v12  ;;  %s488_s5 = sshll.u32 %s904_s23, 3  ;;  %v244_v25 = vadd.s32 128, %v243_v24  ;;  %v245_v27 = vadd.s32 256, %v243_v24 }
  0x4c   : > { %232 = vst.msk [vmem:[#allocation4] sm:$0xff] %vm227_vm0, %v670_v12  ;;  %s208_s10 = scalar_lea.vmem %s887_s1, %s488_s5  ;;  %s221_s27 = scalar_lea.vmem %s889_s3, %s488_s5 }
  0x4d   : > { %255 = vmax.xlane.f32.xlu0 %v254_v7  ;;  %233 = vst.msk [vmem:[#allocation4 + $0x8] sm:$0xff] %vm227_vm0, %v670_v12  ;;  %v811_v13 = vld [vmem:[%s208_s10] sm:$0xff]  ;;  %v814_v14 = vld [vmem:[%s208_s10 + $0x8] sm:$0xff] }
  0x4e   : > { %319 = vperm.xlu2 %552, %v811_v13   ;;  %vm362_vm8 = vcmp.ne.s32.totalorder %v811_v13, 0  ;;  %vm363_vm11 = vcmp.ne.s32.totalorder %v814_v14, 0 }
  0x4f   : > { %v817_v15 = vld [vmem:[#allocation2] sm:$0xff] }
  0x50   : > { %v827_v19 = vld [vmem:[#allocation2 + $0x8] sm:$0xff] }
  0x53   : > { %v316_v0 = vld [vmem:[#allocation4] sm:$0xff] }
  0x54   : > { %v317_v11 = vld [vmem:[#allocation4 + $0x8] sm:$0xff] }
  0x55   : > { %259 = vmax.xlane.f32.xlu0 %v258_v10  ;;  %v264_v10 = vld [vmem:[#allocation3 + $0x8] sm:$0xff] }
  0x56   : > { %322 = vperm.xlu2 %552, %v814_v14  }
  0xa8   : > { %v320_v26 = vpop.permute.xlu2 %319 }
  0xa9   : > { %vm324_vm1 = vcmp.eq.s32.totalorder %v243_v24, %v320_v26  ;;  %vm325_vm2 = vcmp.eq.s32.totalorder %v244_v25, %v320_v26  ;;  %vm326_vm3 = vcmp.eq.s32.totalorder %v245_v27, %v320_v26 }
  0xaa   : > { %v330_v28 = vsel %vm324_vm1, %v234_v1, 0.0  ;;  %v331_v29 = vsel %vm325_vm2, %v235_v2, 0.0  ;;  %v332_v31 = vsel %vm326_vm3, %v236_v3, 0.0 }
  0xab   : > { %v336_v30 = vadd.f32 %v331_v29, %v330_v28 }
  0xad   : > { %v337_v32 = vadd.f32 %v336_v30, %v332_v31 }
  0xaf   : > { %338 = vadd.xlane.f32.xlu2 %v337_v32 }
  0xb0   : > { %v323_v41 = vpop.permute.xlu2 %322 }
  0xb1   : > { %vm327_vm4 = vcmp.eq.s32.totalorder %v243_v24, %v323_v41  ;;  %vm328_vm5 = vcmp.eq.s32.totalorder %v244_v25, %v323_v41  ;;  %vm329_vm6 = vcmp.eq.s32.totalorder %v245_v27, %v323_v41  ;;  %v359_v24 = vstv %s852_s14 }
  0xb2   : > { %v333_v52 = vsel %vm327_vm4, %v789_v5, 0.0  ;;  %v334_v53 = vsel %vm328_vm5, %v795_v9, 0.0  ;;  %v335_v56 = vsel %vm329_vm6, %v791_v6, 0.0 }
  0xb3   : > { %v340_v55 = vadd.f32 %v334_v53, %v333_v52 }
  0xb5   : > { %v341_v60 = vadd.f32 %v340_v55, %v335_v56 }
  0xc0   : > { %v256_v16 = vpop.xlane.xlu0 %255 }
  0xc1   : > { %v820_v17 = vmax.f32 %v817_v15, %v256_v16 }
  0xc3   : > { %v265_v18 = vsub.f32 %v817_v15, %v820_v17  ;;  %314 = vst.msk [vmem:[#allocation2] sm:$0xff] %vm227_vm0, %v820_v17  ;;  %275 = vperm.xlu1 %551, %v820_v17  }
  0xc8   : > { %v260_v20 = vpop.xlane.xlu0 %259 }
  0xc9   : > { %v830_v21 = vmax.f32 %v827_v19, %v260_v20 }
  0xca   : > { %v366_v29 = vld [vmem:[#allocation2] sm:$0xff] }
  0xcb   : > { %v266_v22 = vsub.f32 %v827_v19, %v830_v21  ;;  %315 = vst.msk [vmem:[#allocation2 + $0x8] sm:$0xff] %vm227_vm0, %v830_v21  ;;  %280 = vperm.xlu1 %551, %v830_v21   ;;  %v352_v19 = vshrl.u32 %v242_v23, 7  ;;  %v355_v21 = vstv %s491_s25 }
  0xcd   : > { %v353_v26 = vadd.s32 8, %v352_v19 }
  0xcf   : > { %v357_v31 = vadd.s32 %v355_v21, %v353_v26 }
  0xd1   : > { %vm361_vm10 = vcmp.lt.s32.totalorder %v357_v31, %v359_v24 }
  0xd2   : > { %vm365_vm12 = vmand %vm361_vm10, %vm363_vm11 }
 0x122   : > { %v339_v63 = vpop.xlane.xlu2 %338 }
 0x135   : > { %v276_v33 = vpop.permute.xlu1 %275 }
 0x136   : > { %v283_v34 = vsub.f32 %v234_v1, %v276_v33  ;;  %v284_v35 = vsub.f32 %v235_v2, %v276_v33  ;;  %v285_v36 = vsub.f32 %v236_v3, %v276_v33  ;;  %v344_v1 = vadd.f32 %v339_v63, %v316_v0 }
 0x137   : > { %v267_v2 = vmul.f32 1.442695, %v265_v18  ;;  %v269_v3 = vmul.f32 1.442695, %v266_v22  ;;  %v356_v22 = vadd.s32 %v355_v21, %v352_v19 }
 0x138   : > { %v289_v37 = vmul.f32 1.442695, %v283_v34  ;;  %v291_v38 = vmul.f32 1.442695, %v284_v35  ;;  %v293_v39 = vmul.f32 1.442695, %v285_v36 }
 0x139   : > { %346 = vst.msk [vmem:[#allocation4] sm:$0xff] %vm227_vm0, %v344_v1  ;;  %vm360_vm7 = vcmp.lt.s32.totalorder %v356_v22, %v359_v24  ;;  %v367_v35 = vld [vmem:[#allocation2 + $0x8] sm:$0xff] }
 0x13a   : > { %554 = vpow2.f32 %v289_v37  ;;  %vm364_vm9 = vmand %vm360_vm7, %vm362_vm8 }
 0x13b   : > { %556 = vpow2.f32 %v291_v38 }
 0x13c   : > { %558 = vpow2.f32 %v293_v39 }
 0x13d   : > { %v281_v40 = vpop.permute.xlu1 %280 }
 0x13e   : > { %v286_v42 = vsub.f32 %v789_v5, %v281_v40  ;;  %v287_v43 = vsub.f32 %v795_v9, %v281_v40  ;;  %v288_v44 = vsub.f32 %v791_v6, %v281_v40  ;;  %v263_v5 = vld [vmem:[#allocation3] sm:$0xff] }
 0x140   : > { %v555_v45 = vpop.eup %554  ;;  %v295_v46 = vmul.f32 1.442695, %v286_v42  ;;  %v297_v47 = vmul.f32 1.442695, %v287_v43  ;;  %v299_v49 = vmul.f32 1.442695, %v288_v44 }
 0x141   : > { %v557_v48 = vpop.eup %556  ;;  %v376_v30 = vld [vmem:[#allocation4] sm:$0xff] }
 0x142   : > { %560 = vpow2.f32 %v295_v46  ;;  %v301_v50 = vadd.f32 %v557_v48, %v555_v45  ;;  %v559_v51 = vpop.eup %558 }
 0x143   : > { %562 = vpow2.f32 %v297_v47 }
 0x144   : > { %v302_v54 = vadd.f32 %v559_v51, %v301_v50  ;;  %564 = vpow2.f32 %v299_v49 }
 0x145   : > { %566 = vpow2.f32 %v267_v2 }
 0x146   : > { %303 = vadd.xlane.f32.xlu0 %v302_v54  ;;  %568 = vpow2.f32 %v269_v3 }
 0x148   : > { %v561_v57 = vpop.eup %560 }
 0x149   : > { %v563_v58 = vpop.eup %562 }
 0x14a   : > { %v305_v59 = vadd.f32 %v563_v58, %v561_v57  ;;  %v565_v61 = vpop.eup %564 }
 0x14b   : > { %v567_v4 = vpop.eup %566 }
 0x14c   : > { %v306_v62 = vadd.f32 %v565_v61, %v305_v59  ;;  %v271_v6 = vmul.f32 %v567_v4, %v263_v5  ;;  %v569_v9 = vpop.eup %568 }
 0x14d   : > { %v272_v12 = vmul.f32 %v569_v9, %v264_v10 }
 0x14e   : > { %307 = vadd.xlane.f32.xlu1 %v306_v62  ;;  %342 = vadd.xlane.f32.xlu0 %v341_v60 }
 0x1b9   : > { %v304_v7 = vpop.xlane.xlu0 %303 }
 0x1ba   : > { %v309_v8 = vadd.f32 %v304_v7, %v271_v6 }
 0x1bc   : > { %312 = vst.msk [vmem:[#allocation3] sm:$0xff] %vm227_vm0, %v309_v8 }
 0x1c1   : > { %v308_v15 = vpop.xlane.xlu1 %307  ;;  %v343_v16 = vpop.xlane.xlu0 %342 }
 0x1c2   : > { %v310_v17 = vadd.f32 %v308_v15, %v272_v12  ;;  %v345_v18 = vadd.f32 %v343_v16, %v317_v11 }
 0x1c3   : > { %v368_v20 = vld [vmem:[#allocation3] sm:$0xff] }
 0x1c4   : > { %570 = vlog2.f32 %v368_v20  ;;  %313 = vst.msk [vmem:[#allocation3 + $0x8] sm:$0xff] %vm227_vm0, %v310_v17 }
 0x1c5   : > { %347 = vst.msk [vmem:[#allocation4 + $0x8] sm:$0xff] %vm227_vm0, %v345_v18 }
 0x1ca   : > { %v571_v25 = vpop.eup %570 }
 0x1cb   : > { %v371_v27 = vmul.f32 0.6931472, %v571_v25  ;;  %v369_v28 = vld [vmem:[#allocation3 + $0x8] sm:$0xff] }
 0x1cc   : > { %572 = vlog2.f32 %v369_v28  ;;  %v377_v37 = vld [vmem:[#allocation4 + $0x8] sm:$0xff] }
 0x1cd   : > { %v374_v23 = vadd.f32 %v371_v27, %v366_v29 }
 0x1cf   : > { %v378_v32 = vsub.f32 %v374_v23, %v376_v30 }
 0x1d1   : > { %v380_v33 = vsel %vm364_vm9, %v378_v32, 0.0 }
 0x1d2   : > { %v573_v34 = vpop.eup %572  ;;  %382 = vst.msk [vmem:[%s221_s27] sm:$0xff] %vm227_vm0, %v380_v33 }
 0x1d3   : > { %v373_v13 = vmul.f32 0.6931472, %v573_v34 }
 0x1d5   : > { %v375_v36 = vadd.f32 %v373_v13, %v367_v35 }
 0x1d7   : > { %v379_v38 = vsub.f32 %v375_v36, %v377_v37 }
 0x1d9   : > { %v381_v39 = vsel %vm365_vm12, %v379_v38, 0.0 }
 0x1da   : > { %383 = vst.msk [vmem:[%s221_s27 + $0x8] sm:$0xff] %vm227_vm0, %v381_v39 }
 0x1db PF: > { %s17_s19 = sadd.s32 1, %s663_s19   ;;  %s892_s14 = smov %s647_s15 }
 0x1dc   : > { %p14_p10 = scmp.ge.s32.totalorder %s17_s19, 6   ;;  %s893_s15 = smov %s651_s16 }
 0x1dd   : > { %s894_s16 = smov %s738_s24  ;;  %s895_s17 = smov %s659_s18 }
 0x1de   : > { %s896_s18 = smov %s898_s20  ;;  %16 = sbr.rel (!%p14_p10) target bundleno = 6 (0x6), region = 79 }
 0x1e3   :  { %406 = vsyncpa [#allocation8], 1 }
 0x1e4   :  { %408 = vsyncpa [#allocation8 + $0x1], 1 }

</bundles_post_ra>
